<compile_context>
chip_gen: v6e
topology: v6e:2x2x1
jax: 0.10.0
libtpu: 0.0.40
codegen_flags: <defaults>
</compile_context>

<pallas_src>
import functools

import jax
import jax.numpy as jnp
from jax.experimental import pallas as pl
from jax.experimental.pallas import tpu as pltpu


_VMEM_LIMIT_BYTES = 48 * 1024 * 1024  # < 64 MiB physical VMEM on v7x


# ---------------------------------------------------------------------------
# Shared CBAM MLP head (fused avg/max branches, channels on sublanes)
# ---------------------------------------------------------------------------
def _channel_attention(avg, mx, w1, w2):
    """avg/mx: (C, 1) f32; w1: (Cr, C) f32; w2: (C, Cr) f32 -> (C, 1) f32.

    Computes sigmoid(w2 @ relu(w1 @ avg) + w2 @ relu(w1 @ mx)) as ONE pair of
    dots on the stacked (C, 2) pooled operand.
    """
    c = avg.shape[0]
    col = jax.lax.broadcasted_iota(jnp.int32, (c, 2), 1)
    pooled = jnp.where(col == 0, avg, mx)                             # (C, 2)
    h = jnp.dot(w1, pooled, preferred_element_type=jnp.float32)       # (Cr, 2)
    h = jnp.maximum(h, 0.0)
    o = jnp.dot(w2, h, preferred_element_type=jnp.float32)            # (C, 2)
    # column 0 = avg branch, column 1 = max branch
    return jax.nn.sigmoid(jnp.sum(o, axis=-1, keepdims=True))         # (C, 1)


# ---------------------------------------------------------------------------
# Path A: fused single-pass kernel (small C*HW) -- 1 read + 1 write of x
# ---------------------------------------------------------------------------
def _cie_fused_kernel(x_ref, w1_ref, w2_ref, o_ref):
    # x_ref/o_ref: (C, HW); w1_ref: (Cr, C); w2_ref: (C, Cr)
    xf = x_ref[...].astype(jnp.float32)
    avg = jnp.mean(xf, axis=-1, keepdims=True)                        # (C, 1)
    mx = jnp.max(xf, axis=-1, keepdims=True)                          # (C, 1)
    attn = _channel_attention(avg, mx, w1_ref[...], w2_ref[...])      # (C, 1)
    o_ref[...] = (xf * attn).astype(o_ref.dtype)                      # lane-broadcast


# ---------------------------------------------------------------------------
# Path B pass 1: tiled reduce over HW + MLP on the last tile
# ---------------------------------------------------------------------------
def _cie_reduce_kernel(x_ref, w1_ref, w2_ref, attn_ref, sum_acc, max_acc,
                       *, hw_valid, hw_tile, ragged):
    # x_ref: (C, T); attn_ref: (C, 1); sum_acc/max_acc: (C, 1) f32 VMEM scratch
    t = pl.program_id(1)

    @pl.when(t == 0)
    def _init():
        sum_acc[...] = jnp.zeros_like(sum_acc)
        max_acc[...] = jnp.full(max_acc.shape, -jnp.inf, max_acc.dtype)

    xf = x_ref[...].astype(jnp.float32)                               # (C, T)
    if ragged:
        # Static flag: HW is not a tile multiple, so the last (clipped) tile's
        # VMEM buffer contains stale lanes beyond HW; mask them out.
        lane = jax.lax.broadcasted_iota(jnp.int32, xf.shape, 1)
        valid = (t * hw_tile + lane) < hw_valid
        x_sum = jnp.where(valid, xf, 0.0)
        x_max = jnp.where(valid, xf, -jnp.inf)
    else:
        x_sum = xf
        x_max = xf
    sum_acc[...] += jnp.sum(x_sum, axis=-1, keepdims=True)
    max_acc[...] = jnp.maximum(max_acc[...],
                               jnp.max(x_max, axis=-1, keepdims=True))

    @pl.when(t == pl.num_programs(1) - 1)
    def _finalize():
        avg = sum_acc[...] * (1.0 / hw_valid)
        attn_ref[...] = _channel_attention(avg, max_acc[...],
                                           w1_ref[...], w2_ref[...])


# ---------------------------------------------------------------------------
# Path B pass 2: fully parallel broadcast-scale over (B, HW tiles)
# ---------------------------------------------------------------------------
def _cie_scale_kernel(x_ref, attn_ref, o_ref):
    # x_ref/o_ref: (C, T); attn_ref: (C, 1) -> lane-broadcast multiply.
    # Boundary tiles: out-of-range lanes of the output block are never written
    # back (the pipeline clips the DMA), so no masking is needed here.
    o_ref[...] = (x_ref[...].astype(jnp.float32) * attn_ref[...]).astype(o_ref.dtype)


# ---------------------------------------------------------------------------
# Wrapper
# ---------------------------------------------------------------------------
def _choose_hw_tile(hw, target_lanes):
    """Pick a lane-dense (multiple-of-128) spatial tile <= target.

    Prefers a tile that divides HW exactly (no ragged boundary block); if none
    exists near the target, the last grid step is a clipped partial tile and
    the reduce kernel masks the invalid lanes.  No padding copies are made.
    """
    target = max(128, (target_lanes // 128) * 128)
    if hw <= target:
        return hw                                   # full row: always legal
    t = target
    while t >= max(128, target // 2):
        if hw % t == 0:
            return t
        t -= 128
    return target


def context_information_enhancement(x_nchw, w1, w2, *,
                                     force_tiled=False,
                                     hw_tile_lanes=None,
                                     fused_block_limit_bytes=4 * 1024 * 1024,
                                     tile_block_budget_bytes=2 * 1024 * 1024):
    """x_nchw: (B, C, H, W); w1: (C//r, C); w2: (C, C//r) (bias-free 1x1 convs)."""
    B, C, H, W = x_nchw.shape
    Cr = w1.shape[0]
    assert w1.shape == (Cr, C) and w2.shape == (C, Cr)
    HW = H * W

    x = x_nchw.reshape(B, C, HW)          # free: contiguous NCHW -> (B, C, HW)
    itemsize = x.dtype.itemsize
    w1f = w1.astype(jnp.float32)
    w2f = w2.astype(jnp.float32)

    # Fused-path budget counted in f32-equivalent bytes (in-kernel temporaries
    # are f32 regardless of input dtype).
    use_fused = (not force_tiled) and (C * HW * 4 <= fused_block_limit_bytes)

    if use_fused:
        out = pl.pallas_call(
            _cie_fused_kernel,
            out_shape=jax.ShapeDtypeStruct((B, C, HW), x.dtype),
            grid_spec=pltpu.PrefetchScalarGridSpec(
                num_scalar_prefetch=0,
                grid=(B,),
                in_specs=[
                    pl.BlockSpec((None, C, HW), lambda b: (b, 0, 0)),
                    pl.BlockSpec((Cr, C), lambda b: (0, 0)),
                    pl.BlockSpec((C, Cr), lambda b: (0, 0)),
                ],
                out_specs=pl.BlockSpec((None, C, HW), lambda b: (b, 0, 0)),
            ),
            compiler_params=pltpu.CompilerParams(
                dimension_semantics=("parallel",),
                vmem_limit_bytes=_VMEM_LIMIT_BYTES),
        )(x, w1f, w2f)
        return out.reshape(B, C, H, W)

    # ---- tiled two-pass path (large feature maps) -------------------------
    if hw_tile_lanes is None:
        hw_tile_lanes = tile_block_budget_bytes // max(C * itemsize, 1)
        hw_tile_lanes = max(128, min(hw_tile_lanes, 8192))
    T = _choose_hw_tile(HW, hw_tile_lanes)
    n_t = pl.cdiv(HW, T)
    ragged = (HW % T) != 0

    # Pass 1: per-(batch, channel) attention weights, shape (B, C, 1) f32.
    reduce_kern = functools.partial(
        _cie_reduce_kernel, hw_valid=HW, hw_tile=T, ragged=ragged)
    attn = pl.pallas_call(
        reduce_kern,
        out_shape=jax.ShapeDtypeStruct((B, C, 1), jnp.float32),
        grid_spec=pltpu.PrefetchScalarGridSpec(
            num_scalar_prefetch=0,
            grid=(B, n_t),
            in_specs=[
                pl.BlockSpec((None, C, T), lambda b, t: (b, 0, t)),
                pl.BlockSpec((Cr, C), lambda b, t: (0, 0)),
                pl.BlockSpec((C, Cr), lambda b, t: (0, 0)),
            ],
            out_specs=pl.BlockSpec((None, C, 1), lambda b, t: (b, 0, 0)),
            scratch_shapes=[pltpu.VMEM((C, 1), jnp.float32),   # running sum
                            pltpu.VMEM((C, 1), jnp.float32)],  # running max
        ),
        compiler_params=pltpu.CompilerParams(
            dimension_semantics=("parallel", "arbitrary"),
            vmem_limit_bytes=_VMEM_LIMIT_BYTES),
    )(x, w1f, w2f)

    # Pass 2: lane-broadcast scale, fully parallel over (B, HW tiles).
    out = pl.pallas_call(
        _cie_scale_kernel,
        out_shape=jax.ShapeDtypeStruct((B, C, HW), x.dtype),
        grid_spec=pltpu.PrefetchScalarGridSpec(
            num_scalar_prefetch=0,
            grid=(B, n_t),
            in_specs=[
                pl.BlockSpec((None, C, T), lambda b, t: (b, 0, t)),
                pl.BlockSpec((None, C, 1), lambda b, t: (b, 0, 0)),
            ],
            out_specs=pl.BlockSpec((None, C, T), lambda b, t: (b, 0, t)),
        ),
        compiler_params=pltpu.CompilerParams(
            dimension_semantics=("parallel", "parallel"),
            vmem_limit_bytes=_VMEM_LIMIT_BYTES),
    )(x, attn)

    return out.reshape(B, C, H, W)


# ---------------------------------------------------------------------------
# Pure-JAX reference (f32, mirrors the PyTorch module exactly)
# ---------------------------------------------------------------------------
def _reference(x, w1, w2):
    xf = x.astype(jnp.float32)
    avg = jnp.mean(xf, axis=(2, 3))                                   # (B, C)
    mx = jnp.max(xf, axis=(2, 3))                                     # (B, C)

    def mlp(p):                                                       # (B, C)
        h = jnp.maximum(p @ w1.T, 0.0)                                # (B, Cr)
        return h @ w2.T                                               # (B, C)

    attn = jax.nn.sigmoid(mlp(avg) + mlp(mx))                         # (B, C)
    return (xf * attn[:, :, None, None]).astype(x.dtype)


if __name__ == "__main__":
    key = jax.random.PRNGKey(0)
    k1, k2, k3, k4 = jax.random.split(key, 4)

    # channels=32, reduction_ratio=16 -> hidden=2; batch=2, 16x16 spatial
    B, C, H, W = 2, 32, 16, 16
    reduction_ratio = 16
    Cr = C // reduction_ratio

    x = jax.random.normal(k1, (B, C, H, W), dtype=jnp.float32)
    w1 = jax.random.normal(k2, (Cr, C), dtype=jnp.float32) * 0.1      # C  -> Cr
    w2 = jax.random.normal(k3, (C, Cr), dtype=jnp.float32) * 0.1      # Cr -> C

    ref = _reference(x, w1, w2)

    # 1) fused single-pass path (small feature map)
    out = jax.block_until_ready(context_information_enhancement(x, w1, w2))
    assert out.shape == (B, C, H, W)
    assert jnp.allclose(out, ref, atol=2e-3, rtol=2e-3), "fused path mismatch"

    # 2) tiled two-pass path on the same input (multi-tile accumulation)
    out_t = jax.block_until_ready(
        context_information_enhancement(x, w1, w2,
                                        force_tiled=True, hw_tile_lanes=128))
    assert jnp.allclose(out_t, ref, atol=2e-3, rtol=2e-3), "tiled path mismatch"

    # 3) non-128-aligned spatial size -> ragged boundary tile, no padding copy
    #    (HW=300, T=128 -> 3 tiles, last one clipped + masked)
    B2, C2, H2, W2 = 2, 32, 12, 25
    x2 = jax.random.normal(k4, (B2, C2, H2, W2), dtype=jnp.float32)
    ref2 = _reference(x2, w1, w2)
    out2 = jax.block_until_ready(
        context_information_enhancement(x2, w1, w2,
                                        force_tiled=True, hw_tile_lanes=128))
    assert jnp.allclose(out2, ref2, atol=2e-3, rtol=2e-3), "ragged path mismatch"

    print("KERNEL_OK")
</pallas_src>

<mosaic_0001>
module attributes {stable_mosaic.version = 11 : i64} {
  func.func @_cie_fused_kernel(%arg0: i32, %arg1: memref<1x32x256xf32, #tpu.memory_space<vmem>>, %arg2: memref<2x32xf32, #tpu.memory_space<vmem>>, %arg3: memref<32x2xf32, #tpu.memory_space<vmem>>, %arg4: memref<1x32x256xf32, #tpu.memory_space<vmem>>) attributes {dimension_semantics = [#tpu.dimension_semantics<parallel>], iteration_bounds = array<i64: 2>, scalar_prefetch = 0 : i64, scratch_operands = 0 : i64, tpu.core_type = #tpu.core_type<tc>, window_params = [{transform_indices = @transform_0, window_bounds = array<i64: 1, 32, 256>}, {pipeline_mode = #tpu.pipeline_mode<synchronous>, transform_indices = @transform_1, window_bounds = array<i64: 2, 32>}, {pipeline_mode = #tpu.pipeline_mode<synchronous>, transform_indices = @transform_2, window_bounds = array<i64: 32, 2>}, {transform_indices = @transform_3, window_bounds = array<i64: 1, 32, 256>}]} {
    %c0 = arith.constant 0 : index
    %c0_0 = arith.constant 0 : index
    %c0_1 = arith.constant 0 : index
    %0 = vector.load %arg1[%c0, %c0_0, %c0_1] : memref<1x32x256xf32, #tpu.memory_space<vmem>>, vector<1x32x256xf32>
    %1 = vector.shape_cast %0 : vector<1x32x256xf32> to vector<32x256xf32>
    %cst = arith.constant dense<0.000000e+00> : vector<32xf32>
    %2 = vector.multi_reduction <add>, %1, %cst [1] : vector<32x256xf32> to vector<32xf32>
    %3 = vector.shape_cast %2 : vector<32xf32> to vector<32x1xf32>
    %cst_2 = arith.constant 2.560000e+02 : f32
    %4 = vector.broadcast %cst_2 : f32 to vector<32x1xf32>
    %5 = arith.divf %3, %4 : vector<32x1xf32>
    %cst_3 = arith.constant dense<0xFF800000> : vector<32xf32>
    %6 = vector.multi_reduction <maximumf>, %1, %cst_3 [1] : vector<32x256xf32> to vector<32xf32>
    %7 = vector.shape_cast %6 : vector<32xf32> to vector<32x1xf32>
    %c0_4 = arith.constant 0 : index
    %c0_5 = arith.constant 0 : index
    %8 = vector.load %arg2[%c0_4, %c0_5] : memref<2x32xf32, #tpu.memory_space<vmem>>, vector<2x32xf32>
    %c0_6 = arith.constant 0 : index
    %c0_7 = arith.constant 0 : index
    %9 = vector.load %arg3[%c0_6, %c0_7] : memref<32x2xf32, #tpu.memory_space<vmem>>, vector<32x2xf32>
    %10 = tpu.iota {dimensions = array<i32: 1>} : vector<32x2xi32>
    %c0_i32 = arith.constant 0 : i32
    %11 = vector.broadcast %c0_i32 : i32 to vector<32x2xi32>
    %12 = arith.cmpi eq, %10, %11 : vector<32x2xi32>
    %13 = vector.shape_cast %5 : vector<32x1xf32> to vector<32x1xf32>
    %14 = vector.broadcast %13 : vector<32x1xf32> to vector<32x2xf32>
    %15 = vector.shape_cast %7 : vector<32x1xf32> to vector<32x1xf32>
    %16 = vector.broadcast %15 : vector<32x1xf32> to vector<32x2xf32>
    %17 = arith.select %12, %14, %16 : vector<32x2xi1>, vector<32x2xf32>
    %cst_8 = arith.constant dense<0.000000e+00> : vector<2x2xf32>
    %18 = tpu.matmul %8, %17, %cst_8 {dimension_numbers = #tpu.dot_dimension_numbers<[1], [0], [0], [1], [0, 0, 1, 1], [], []>} : vector<2x32xf32>, vector<32x2xf32>, vector<2x2xf32> -> vector<2x2xf32>
    %cst_9 = arith.constant 0.000000e+00 : f32
    %19 = vector.broadcast %cst_9 : f32 to vector<2x2xf32>
    %20 = arith.maximumf %18, %19 : vector<2x2xf32>
    %cst_10 = arith.constant dense<0.000000e+00> : vector<32x2xf32>
    %21 = tpu.matmul %9, %20, %cst_10 {dimension_numbers = #tpu.dot_dimension_numbers<[1], [0], [0], [1], [0, 0, 1, 1], [], []>} : vector<32x2xf32>, vector<2x2xf32>, vector<32x2xf32> -> vector<32x2xf32>
    %cst_11 = arith.constant dense<0.000000e+00> : vector<32xf32>
    %22 = vector.multi_reduction <add>, %21, %cst_11 [1] : vector<32x2xf32> to vector<32xf32>
    %23 = vector.shape_cast %22 : vector<32xf32> to vector<32x1xf32>
    %24 = arith.negf %23 : vector<32x1xf32>
    %25 = math.exp %24 : vector<32x1xf32>
    %cst_12 = arith.constant 1.000000e+00 : f32
    %26 = vector.broadcast %cst_12 : f32 to vector<32x1xf32>
    %27 = arith.addf %26, %25 : vector<32x1xf32>
    %28 = arith.divf %26, %27 : vector<32x1xf32>
    %29 = vector.broadcast %28 : vector<32x1xf32> to vector<32x256xf32>
    %30 = arith.mulf %1, %29 : vector<32x256xf32>
    %c0_13 = arith.constant 0 : index
    %c0_14 = arith.constant 0 : index
    %c0_15 = arith.constant 0 : index
    %31 = vector.load %arg4[%c0_13, %c0_14, %c0_15] : memref<1x32x256xf32, #tpu.memory_space<vmem>>, vector<1x32x256xf32>
    %32 = vector.shape_cast %31 : vector<1x32x256xf32> to vector<32x256xf32>
    %33 = vector.shape_cast %30 : vector<32x256xf32> to vector<1x32x256xf32>
    tpu.vector_store %arg4[%c0_13, %c0_14, %c0_15], %33 {strides = array<i32>} : memref<1x32x256xf32, #tpu.memory_space<vmem>>, vector<1x32x256xf32>,
    return
  }
  func.func @transform_0(%arg0: i32) -> (i32, i32, i32) {
    %c0_i32 = arith.constant 0 : i32
    %c0_i32_0 = arith.constant 0 : i32
    %c0_i32_1 = arith.constant 0 : i32
    return %arg0, %c0_i32, %c0_i32_0 : i32, i32, i32
  }
  func.func @transform_1(%arg0: i32) -> (i32, i32) {
    %c0_i32 = arith.constant 0 : i32
    %c0_i32_0 = arith.constant 0 : i32
    %c0_i32_1 = arith.constant 0 : i32
    return %c0_i32, %c0_i32_0 : i32, i32
  }
  func.func @transform_2(%arg0: i32) -> (i32, i32) {
    %c0_i32 = arith.constant 0 : i32
    %c0_i32_0 = arith.constant 0 : i32
    %c0_i32_1 = arith.constant 0 : i32
    return %c0_i32, %c0_i32_0 : i32, i32
  }
  func.func @transform_3(%arg0: i32) -> (i32, i32, i32) {
    %c0_i32 = arith.constant 0 : i32
    %c0_i32_0 = arith.constant 0 : i32
    %c0_i32_1 = arith.constant 0 : i32
    return %arg0, %c0_i32, %c0_i32_0 : i32, i32, i32
  }
}

</mosaic_0001>

<bundles_post_ra>
// kernel: tpu_custom_call.1
= control target key start
LH: loop header
LB: loop body
LE: loop exit
PB: predicated region body
PF: predicated region fallthrough
CT: control target
= control target key end

     0   :  { %8 = vsyncpa [#allocation3], 0  ;;  %s1024_s0 = inlined_call_operand.hbm [shape: f32[2,32,256], index: 0, kind: input, shape index: {}]   ;;  %s1025_s1 = inlined_call_operand.vmem [shape: f32[2,32], index: 1, kind: input, shape index: {}]   ;;  %s1026_s2 = inlined_call_operand.vmem [shape: f32[32,2], index: 2, kind: input, shape index: {}]   ;;  %s1027_s3 = inlined_call_operand.hbm [shape: f32[2,32,256], index: 3, kind: output, shape index: {}]  }
   0x1   :  { %10 = vsyncpa [#allocation3 + $0x1], 0 }
   0x2   :  { %11 = vsyncpa [#allocation4], 0 }
   0x3   :  { %13 = vsyncpa [#allocation4 + $0x1], 0  ;;  %s799_s12 = smov 0   ;;  %s801_s13 = smov 0  }
   0x4   :  { %s803_s14 = smov 0   ;;  %s805_s15 = smov 0  }
   0x5 LB: > { %s820_s16 = sadd.s32 4294967295, %s769_s15   ;;  %s554_s17 = sadd.s32 4294967294, %s769_s15   ;;  %s769_s15 = sphi %s805_s15, %s1042_s15   ;;  %s765_s14 = sphi %s803_s14, %s1041_s14   ;;  %s761_s13 = sphi %s801_s13, %s1040_s13   ;;  %s757_s12 = sphi %s799_s12, %s1039_s12  }
   0x6   : > { %s824_s18 = sadd.s32 1, %s769_s15   ;;  %s26_s19 = sadd.s32 1, %s765_s14 }
   0x7   : > { %s23_s20 = ssub.s32 %s769_s15, %s824_s18  ;;  %p33_p0 = scmp.ne.s32.totalorder %s765_s14, %s761_s13 }
   0x8   : > { %p24_p1 = scmp.eq.s32.totalorder %s23_s20, 0  ;;  %p34_p2 = scmp.eq.s32.totalorder %s769_s15, 0 }
   0x9   : > { %p39_p3 = scmp.ne.s32.totalorder %s761_s13, %s757_s12  ;;  %p40_p4 = scmp.eq.s32.totalorder %s820_s16, 0 }
   0xa   : > { %s836_s21 = scalar_select %p24_p1, %s765_s14, %s26_s19  }
   0xb   : > { %p838_p5 = por %p34_p2, %p33_p0  ;;  %p842_p6 = por %p40_p4, %p39_p3 }
   0xc   : > { %p105_p7 = scmp.eq.s32.totalorder %s820_s16, 1  ;;  %p111_p8 = scmp.eq.s32.totalorder %s554_s17, 1 }
   0xd   : > { %s1031_s23 = scalar_select %p842_p6, 1, 0 }
   0xe   : > { %p621_p10 = scmp.lt.s32.totalorder %s769_s15, 2  ;;  %p849_p11 = por %p105_p7, %p33_p0 }
   0xf   : > { %p853_p12 = por %p111_p8, %p39_p3  ;;  %s137_s26 = sand.u32 1, %s765_s14  }
  0x10   : > { %s1032_s24 = scalar_select %p849_p11, 1, 0 }
  0x11   : > { %s1033_s25 = scalar_select %p853_p12, 1, 0 }
  0x12   : > { %s578_s27 = sshll.u32 %s769_s15, 10  ;;  %s557_s28 = sshll.u32 %s137_s26, 6 }
  0x13   : > { %s862_s4 = scalar_lea.hbm %s1024_s0, %s578_s27  ;;  %s141_s5 = scalar_lea.vmem [#allocation2], %s557_s28 }
  0x14   : > { %s148_s6 = sshll.u32 %s141_s5, 4  ;;  %p866_p13 = pnand %p621_p10, %p838_p5  ;;  %s870_s6 = int_to_ptr.vmem [resolvable:$true] %s148_s6 }
  0x15   : > { %s872_s8 = scalar_lea.sflag [#allocation3], %s137_s26  ;;  %s677_s9 = scalar_lea.hbm %s862_s4, 1024 }
  0x16   : > { %p678_p0 = scmp.ne.s32.totalorder %s862_s4, %s677_s9  ;;  %p679_p1 = pneg %p866_p13 }
  0x17   : > { %s682_s17 = scalar_lea.hbm %s1024_s0, 2048  ;;  %p683_p4 = scmp.lt.s32.totalorder %s862_s4, %s1024_s0 }
  0x18   : > { %p680_p2 = pnand %p679_p1, %p678_p0  ;;  %p684_p5 = scmp.lt.s32.totalorder %s682_s17, %s677_s9 }
  0x1a   : > { %p681_p3 = pneg %p680_p2  ;;  %p685_p7 = por %p684_p5, %p683_p4 }
  0x1c   : > { %p686_p8 = pnand %p685_p7, %p681_p3 }
  0x1e   : > { %689 = shalt.err (!%p686_p8)
}
  0x1f   : > { %s690_s22 = scalar_lea.vmem %s870_s6, 1024  ;;  %s771_s26 = smov [#allocation2]  }
  0x20   : > { %p691_p10 = scmp.ne.s32.totalorder %s870_s6, %s690_s22  ;;  %s695_s27 = sshll.u32 %s771_s26, 4  ;;  %s696_s27 = int_to_ptr.vmem [resolvable:$false] %s695_s27 }
  0x21   : > { %s697_s28 = scalar_lea.vmem %s696_s27, 2048  ;;  %p698_p2 = scmp.lt.s32.totalorder %s870_s6, %s696_s27 }
  0x22   : > { %p693_p9 = pnand %p691_p10, %p679_p1  ;;  %p699_p12 = scmp.lt.s32.totalorder %s697_s28, %s690_s22 }
  0x24   : > { %p694_p0 = pneg %p693_p9  ;;  %p700_p11 = por %p699_p12, %p698_p2 }
  0x26   : > { %p701_p6 = pnand %p700_p11, %p694_p0 }
  0x28   : > { %704 = shalt.err (!%p701_p6)
}
  0x29   : > { %s772_s29 = smov 256   ;;  %s773_s30 = smov 16  }
  0x2a   : > { %616 = dma.hbm_to_vmem [thread:$0]  (!%p866_p13), %s862_s4, 1024, %s870_s6, %s872_s8, %s772_s29, %s772_s29, %s773_s30  }
  0x2b   : > { %p560_p9 = scmp.ge.s32.totalorder %s769_s15, 1  ;;  %p156_p1 = scmp.lt.s32.totalorder %s769_s15, 3 }
  0x2d   : > { %p157_p3 = pnand %p560_p9, %p156_p1 }
  0x2e   : > { %s896_s5 = sand.u32 (!%p157_p3), 1, %s761_s13   ;;  %p1035_p6 = scmp.ne.s32.totalorder (!%p157_p3), %s1031_s23, 0 }
  0x2f   : > { %160 = sbr.rel (%p157_p3) target bundleno = 793 (0x319), region = 32  ;;  %s561_s9 = sshll.u32 (!%p157_p3), %s896_s5, 6 }
  0x30   : > { %s163_s10 = scalar_lea.sflag (!%p157_p3), [#allocation3], %s896_s5  ;;  %s166_s11 = scalar_lea.vmem (!%p157_p3), [#allocation2], %s561_s9 }
  0x34   : > { %748 = dma.done.wait (%p1035_p6), %s163_s10, 1024  }
  0x35   : > { %750 = vsyncadd (%p1035_p6), %s163_s10, 4294966272  ;;  %v906_v0 = vld [vmem:[%s166_s11 + $0x30] sm:$0xff]  ;;  %v908_v1 = vld [vmem:[%s166_s11 + $0x38] sm:$0xff]  ;;  %v774_v16 = vmov 0.0   ;;  %vm775_vm0 = vmmov 0   ;;  %v231_v17 = vlaneseq  ;;  %vm238_vm2 = vcmask 261120  }
  0x36   : > { %v910_v2 = vld [vmem:[%s166_s11 + $0x20] sm:$0xff]  ;;  %v223_v3 = vmax.f32 %v906_v0, %v908_v1  ;;  %v206_v4 = vadd.f32 %v908_v1, %v906_v0  ;;  %v916_v5 = vld [vmem:[%s166_s11 + $0x28] sm:$0xff]  ;;  %v918_v6 = vld [vmem:[%s166_s11 + $0x10] sm:$0xff]  ;;  %590 = vmatprep.subr.mxu0 %v774_v16  ;;  %598 = vmatprep.mubr.msk.f32.mxu0 %vm775_vm0, %v774_v16  ;;  %vm313_vm3 = vcmask 15360   ;;  %vm326_vm4 = vcmask 1041408   ;;  %s188_s27 = scalar_lea.vmem [#allocation5], %s561_s9 }
  0x37   : > { %v920_v7 = vld [vmem:[%s166_s11 + $0x18] sm:$0xff]  ;;  %v203_v8 = vadd.f32 %v916_v5, %v910_v2  ;;  %v926_v10 = vld [vmem:[%s166_s11] sm:$0xff]  ;;  %v928_v11 = vld [vmem:[%s166_s11 + $0x8] sm:$0xff]  ;;  %v220_v12 = vmax.f32 %v910_v2, %v916_v5  ;;  %v232_v18 = vand.u32 127, %v231_v17  ;;  %s579_s28 = sshll.u32 %s820_s16, 10  ;;  %s481_s29 = sshll.u32 %s188_s27, 4  ;;  %s979_s29 = int_to_ptr.vmem [resolvable:$true] %s481_s29 }
  0x38   : > { %224 = vmax.xlane.f32.xlu1 %v223_v3  ;;  %207 = vadd.xlane.f32.xlu0 %v206_v4  ;;  %v200_v9 = vadd.f32 %v920_v7, %v918_v6  ;;  %v197_v13 = vadd.f32 %v928_v11, %v926_v10  ;;  %v217_v14 = vmax.f32 %v918_v6, %v920_v7  ;;  %v226_v34 = vld [vmem:[%s1025_s1] sm:$0x3]  ;;  %v228_v40 = vld [vmem:[%s1026_s2 + $0x8] sm:$0xff]  ;;  %v229_v41 = vld [vmem:[%s1026_s2 + $0x10] sm:$0xff]  ;;  %s977_s10 = scalar_lea.hbm %s1027_s3, %s579_s28  ;;  %s468_s16 = scalar_lea.sflag [#allocation4], %s896_s5 }
  0x39   : > { %v214_v15 = vmax.f32 %v926_v10, %v928_v11  ;;  %vm233_vm1 = vcmp.eq.s32.totalorder %v232_v18, 0  ;;  %v227_v36 = vld [vmem:[%s1026_s2] sm:$0xff]  ;;  %v230_v42 = vld [vmem:[%s1026_s2 + $0x18] sm:$0xff]  ;;  %s705_s11 = scalar_lea.vmem %s979_s29, 1024  ;;  %p1036_p12 = scmp.ne.s32.totalorder %s1032_s24, 0 }
  0x3a   : > { %603 = vmatprep.mubr.msk.f32.mxu1 %vm313_vm3, %v227_v36  ;;  %p706_p11 = scmp.ne.s32.totalorder %s979_s29, %s705_s11  ;;  %s776_s23 = smov [#allocation5]  }
  0x3b   : > { %s709_s4 = sshll.u32 %s776_s23, 4  ;;  %s710_s4 = int_to_ptr.vmem [resolvable:$false] %s709_s4 }
  0x3c   : > { %204 = vadd.xlane.f32.xlu0 %v203_v8  ;;  %201 = vadd.xlane.f32.xlu1 %v200_v9  ;;  %p707_p13 = pnand %p706_p11, %p1036_p12  ;;  %s711_s6 = scalar_lea.vmem %s710_s4, 2048 }
  0x3d   : > { %p712_p5 = scmp.lt.s32.totalorder %s979_s29, %s710_s4  ;;  %p713_p7 = scmp.lt.s32.totalorder %s711_s6, %s705_s11 }
  0x3e   : > { %p708_p4 = pneg %p707_p13 }
  0x3f   : > { %p714_p8 = por %p713_p7, %p712_p5 }
  0x40   : > { %221 = vmax.xlane.f32.xlu0 %v220_v12  ;;  %198 = vadd.xlane.f32.xlu1 %v197_v13 }
  0x41   : > { %p715_p10 = pnand %p714_p8, %p708_p4 }
  0x44   : > { %218 = vmax.xlane.f32.xlu0 %v217_v14  ;;  %215 = vmax.xlane.f32.xlu1 %v214_v15 }
  0xc1   : > { %v225_v19 = vpop.xlane.xlu1 %224  ;;  %v208_v20 = vpop.xlane.xlu0 %207 }
  0xc2   : > { %v213_v21 = vmul.f32 0.00390625, %v208_v20 }
  0xc4   : > { %v237_v22 = vsel %vm233_vm1, %v213_v21, %v225_v19 }
  0xc5   : > { %591 = vmatpush3.msra.mxu0 %v237_v22  ;;  %v205_v23 = vpop.xlane.xlu0 %204  ;;  %v202_v24 = vpop.xlane.xlu1 %201 }
  0xc6   : > { %592 = vmatprep.subr.mxu0 %v774_v16  ;;  %v212_v25 = vmul.f32 0.00390625, %v205_v23  ;;  %v211_v29 = vmul.f32 0.00390625, %v202_v24 }
  0xc9   : > { %v222_v26 = vpop.xlane.xlu0 %221  ;;  %v199_v27 = vpop.xlane.xlu1 %198 }
  0xca   : > { %v236_v28 = vsel %vm233_vm1, %v212_v25, %v222_v26  ;;  %v210_v30 = vmul.f32 0.00390625, %v199_v27 }
  0xcb   : > { %593 = vmatpush3.msra.mxu0 %v236_v28 }
  0xcc   : > { %594 = vmatprep.subr.mxu0 %v774_v16 }
  0xcd   : > { %v219_v31 = vpop.xlane.xlu0 %218  ;;  %v216_v32 = vpop.xlane.xlu1 %215 }
  0xce   : > { %v235_v33 = vsel %vm233_vm1, %v211_v29, %v219_v31  ;;  %v234_v35 = vsel %vm233_vm1, %v210_v30, %v216_v32 }
  0xcf   : > { %595 = vmatpush3.msra.mxu0 %v235_v33 }
  0xd0   : > { %596 = vmatprep.subr.mxu0 %v774_v16 }
  0xd1   : > { %597 = vmatpush3.msra.mxu0 %v234_v35 }
  0xd2   : > { %599 = vmatmul.mubr.msk.f32.vlgmr.msra.gmra.mxu0 %vm238_vm2, %v226_v34 }
 0x192   : > { %v308_v37 = vpop.f32.mrf.mxu0 }
 0x193   : > { %v312_v38 = vmax.f32 %v308_v37, 0.0 }
 0x194   : > { %v600_v39 = vpop.f32.mrf.mxu0 }
 0x195   : > { %601 = vmatprep.subr.msk.mxu1 %vm326_vm4, %v312_v38 }
 0x196   : > { %602 = vmatpush3.msk.msra.mxu1 %vm326_vm4, %v312_v38 }
 0x197   : > { %604 = vmatmul.mubr.msk.f32.vlgmr.msra.gmra.mxu1 %vm313_vm3, %v228_v40 }
 0x198   : > { %606 = vmatprep.mubr.msk.f32.mxu1 %vm313_vm3, %v229_v41 }
 0x19b   : > { %607 = vmatmul.mubr.msk.f32.gmra.mxu1 %vm313_vm3, %v230_v42 }
 0x257   : > { %v605_v43 = vpop.f32.mrf.mxu1 }
 0x258   : > { %v418_v44 = vsel %vm313_vm3, %v605_v43, 0.0 }
 0x259   : > { %419 = vadd.xlane.f32.xlu1 %v418_v44  ;;  %v396_v45 = vpop.f32.mrf.mxu1 }
 0x25a   : > { %v415_v46 = vsel %vm313_vm3, %v396_v45, 0.0 }
 0x25b   : > { %416 = vadd.xlane.f32.xlu0 %v415_v46  ;;  %v608_v47 = vpop.f32.mrf.mxu1 }
 0x25c   : > { %v424_v48 = vsel %vm313_vm3, %v608_v47, 0.0 }
 0x25d   : > { %425 = vadd.xlane.f32.xlu1 %v424_v48  ;;  %v406_v49 = vpop.f32.mrf.mxu1 }
 0x25e   : > { %v421_v50 = vsel %vm313_vm3, %v406_v49, 0.0 }
 0x25f   : > { %422 = vadd.xlane.f32.xlu0 %v421_v50 }
 0x2e2   : > { %v420_v51 = vpop.xlane.xlu1 %419 }
 0x2e3   : > { %v570_v52 = vmul.f32 -1.442695, %v420_v51 }
 0x2e4   : > { %v417_v53 = vpop.xlane.xlu0 %416 }
 0x2e5   : > { %661 = vpow2.f32 %v570_v52  ;;  %v569_v54 = vmul.f32 -1.442695, %v417_v53 }
 0x2e6   : > { %v426_v55 = vpop.xlane.xlu1 %425 }
 0x2e7   : > { %663 = vpow2.f32 %v569_v54  ;;  %v572_v56 = vmul.f32 -1.442695, %v426_v55 }
 0x2e8   : > { %v423_v57 = vpop.xlane.xlu0 %422 }
 0x2e9   : > { %665 = vpow2.f32 %v572_v56  ;;  %v571_v58 = vmul.f32 -1.442695, %v423_v57 }
 0x2eb   : > { %667 = vpow2.f32 %v571_v58 }
 0x2f2   : > { %v662_v59 = vpop.eup %661 }
 0x2f3   : > { %v440_v60 = vadd.f32 1.0, %v662_v59 }
 0x2f4   : > { %v664_v61 = vpop.eup %663 }
 0x2f5   : > { %669 = vrcp.f32 %v440_v60  ;;  %v439_v62 = vadd.f32 1.0, %v664_v61 }
 0x2f6   : > { %v666_v63 = vpop.eup %665 }
 0x2f7   : > { %671 = vrcp.f32 %v439_v62  ;;  %v442_v3 = vadd.f32 1.0, %v666_v63 }
 0x2f8   : > { %v668_v4 = vpop.eup %667 }
 0x2f9   : > { %673 = vrcp.f32 %v442_v3  ;;  %v441_v8 = vadd.f32 1.0, %v668_v4 }
 0x2fb   : > { %675 = vrcp.f32 %v441_v8 }
 0x302   : > { %v670_v9 = vpop.eup %669 }
 0x303   : > { %v453_v12 = vmul.f32 %v670_v9, %v918_v6  ;;  %v454_v13 = vmul.f32 %v670_v9, %v920_v7 }
 0x304   : > { %v672_v14 = vpop.eup %671 }
 0x305   : > { %461 = vst [vmem:[%s188_s27 + $0x10] sm:$0xff] %v453_v12  ;;  %462 = vst [vmem:[%s188_s27 + $0x18] sm:$0xff] %v454_v13  ;;  %v451_v15 = vmul.f32 %v672_v14, %v926_v10  ;;  %v452_v16 = vmul.f32 %v672_v14, %v928_v11 }
 0x306   : > { %v674_v17 = vpop.eup %673 }
 0x307   : > { %459 = vst [vmem:[%s188_s27] sm:$0xff] %v451_v15  ;;  %460 = vst [vmem:[%s188_s27 + $0x8] sm:$0xff] %v452_v16  ;;  %v457_v6 = vmul.f32 %v674_v17, %v906_v0  ;;  %v458_v7 = vmul.f32 %v674_v17, %v908_v1 }
 0x308   : > { %v676_v18 = vpop.eup %675 }
 0x309   : > { %465 = vst [vmem:[%s188_s27 + $0x30] sm:$0xff] %v457_v6  ;;  %466 = vst [vmem:[%s188_s27 + $0x38] sm:$0xff] %v458_v7  ;;  %v455_v10 = vmul.f32 %v676_v18, %v910_v2  ;;  %v456_v11 = vmul.f32 %v676_v18, %v916_v5 }
 0x30b   : > { %463 = vst [vmem:[%s188_s27 + $0x20] sm:$0xff] %v455_v10  ;;  %464 = vst [vmem:[%s188_s27 + $0x28] sm:$0xff] %v456_v11 }
 0x30c   : > { %718 = shalt.err (!%p715_p10)
}
 0x30d   : > { %s719_s7 = scalar_lea.hbm %s977_s10, 1024  ;;  %s723_s19 = scalar_lea.hbm %s1027_s3, 2048 }
 0x30e   : > { %p720_p0 = scmp.ne.s32.totalorder %s977_s10, %s719_s7  ;;  %p724_p1 = scmp.lt.s32.totalorder %s977_s10, %s1027_s3 }
 0x30f   : > { %p725_p3 = scmp.lt.s32.totalorder %s723_s19, %s719_s7 }
 0x310   : > { %p721_p2 = pnand %p720_p0, %p1036_p12 }
 0x311   : > { %p726_p6 = por %p725_p3, %p724_p1 }
 0x312   : > { %p722_p9 = pneg %p721_p2 }
 0x314   : > { %p727_p11 = pnand %p726_p6, %p722_p9 }
 0x316   : > { %730 = shalt.err (!%p727_p11)
}
 0x317   : > { %s777_s26 = smov 256   ;;  %s778_s27 = smov 16  }
 0x318   : > { %611 = dma.vmem_to_hbm [thread:$0]  (%p1036_p12), %s979_s29, 1024, %s977_s10, %s468_s16, %s777_s26, %s777_s26, %s778_s27  }
 0x319 PF: > { %s496_s28 = sand.u32 1, %s757_s12   ;;  %p1037_p13 = scmp.ne.s32.totalorder %s1033_s25, 0 }
 0x31a   : > { %p1038_p4 = scmp.ge.s32.totalorder %s769_s15, 2  ;;  %s497_s30 = scalar_lea.sflag [#allocation4], %s496_s28 }
 0x31c   : > { %p618_p5 = pnand %p1038_p4, %p1037_p13 }
 0x31e   : > { %p619_p7 = pneg %p618_p5 }
 0x320   : > { %752 = dma.done.wait (%p619_p7), %s497_s30, 1024  }
 0x321   : > { %754 = vsyncadd (%p619_p7), %s497_s30, 4294966272  ;;  %p16_p8 = scmp.ge.s32.totalorder %s824_s18, 4   ;;  %s1039_s12 = smov %s761_s13 }
 0x322   : > { %s1040_s13 = smov %s765_s14  ;;  %s1041_s14 = smov %s836_s21 }
 0x323   : > { %s1042_s15 = smov %s824_s18  ;;  %18 = sbr.rel (!%p16_p8) target bundleno = 5 (0x5), region = 77 }
 0x328   :  { %502 = vsyncpa [#allocation3], 1 }
 0x329   :  { %504 = vsyncpa [#allocation3 + $0x1], 1 }
 0x32a   :  { %505 = vsyncpa [#allocation4], 1 }
 0x32b   :  { %507 = vsyncpa [#allocation4 + $0x1], 1 }

</bundles_post_ra>
